<compile_context>
chip_gen: v6e
topology: v6e:2x2x1
jax: 0.10.0
libtpu: 0.0.40
codegen_flags: <defaults>
</compile_context>

<pallas_src>
import jax
import jax.numpy as jnp
from jax.experimental import pallas as pl
from jax.experimental.pallas import tpu as pltpu

_LANE = 128


def _round_up(n, m):
    return ((n + m - 1) // m) * m


def _mlp_kernel(x_ref, w1_ref, b1_ref, w2_ref, b2_ref, w3t_ref, b3_ref, o_ref):
    # x_ref:  [8, TB] f32   (features on sublanes, batch on lanes)
    # w1_ref: [64, 8] bf16, w2_ref: [64, 64] bf16  (torch-native [out, in])
    # b1/b2:  [64, 1] f32, w3t_ref: [64, 1] f32, b3_ref: SMEM scalar (1,)
    # o_ref:  [1, TB] f32

    # Layer 1: [64, 8] @ [8, TB] -> [64, TB] on MXU (bf16 ops, f32 accum).
    x_bf = x_ref[...].astype(jnp.bfloat16)
    h1 = jnp.dot(w1_ref[...], x_bf, preferred_element_type=jnp.float32)
    h1 = jnp.maximum(h1 + b1_ref[...], 0.0)

    # Layer 2: [64, 64] @ [64, TB] -> [64, TB] on MXU (bf16 ops, f32 accum).
    h2 = jnp.dot(w2_ref[...], h1.astype(jnp.bfloat16),
                 preferred_element_type=jnp.float32)
    h2 = jnp.maximum(h2 + b2_ref[...], 0.0)

    # Layer 3 (out_features=1) on VPU/XLU: broadcast-mul + sublane reduce.
    out = jnp.sum(w3t_ref[...] * h2, axis=0, keepdims=True)   # [1, TB]
    o_ref[...] = (out + b3_ref[0]).astype(o_ref.dtype)


def neural_net_forward(x, params, *, max_tile=8192):
    """x: [batch, 8] float32. params hold torch-native Linear weights/biases."""
    batch, in_f = x.shape

    # Pad the batch only to the 128-lane boundary (decoupled from tile size).
    padded = _round_up(batch, _LANE)

    # Tile size: as large as possible (amortize per-step overhead), but keep
    # at least 2 grid steps once the batch allows it (v7x dual TensorCore).
    tb = min(max_tile, padded)
    if padded >= 2 * _LANE:
        tb = min(tb, _round_up(pl.cdiv(padded, 2), _LANE))
    grid = pl.cdiv(padded, tb)          # last tile may be partial (masked)

    # Batch-on-lanes layout.
    xt = x.T                                            # [8, batch]
    if padded != batch:
        xt = jnp.pad(xt, ((0, 0), (0, padded - batch)))  # <= 127 pad columns

    w1 = params["w1"].astype(jnp.bfloat16)              # [64, 8]
    b1 = params["b1"].reshape(64, 1)
    w2 = params["w2"].astype(jnp.bfloat16)              # [64, 64]
    b2 = params["b2"].reshape(64, 1)
    w3t = params["w3"].reshape(64, 1)                   # [1, 64] -> [64, 1]
    b3 = params["b3"].reshape(1)                        # scalar -> SMEM

    out_t = pl.pallas_call(
        _mlp_kernel,
        out_shape=jax.ShapeDtypeStruct((1, padded), jnp.float32),
        grid_spec=pltpu.PrefetchScalarGridSpec(
            num_scalar_prefetch=0,
            grid=(grid,),
            in_specs=[
                pl.BlockSpec((in_f, tb), lambda i: (0, i)),   # x^T tile
                pl.BlockSpec((64, in_f), lambda i: (0, 0)),   # w1 (resident)
                pl.BlockSpec((64, 1), lambda i: (0, 0)),      # b1
                pl.BlockSpec((64, 64), lambda i: (0, 0)),     # w2
                pl.BlockSpec((64, 1), lambda i: (0, 0)),      # b2
                pl.BlockSpec((64, 1), lambda i: (0, 0)),      # w3^T
                pl.BlockSpec(memory_space=pltpu.MemorySpace.SMEM),  # b3
            ],
            out_specs=pl.BlockSpec((1, tb), lambda i: (0, i)),
        ),
        compiler_params=pltpu.CompilerParams(
            dimension_semantics=("parallel",),
            vmem_limit_bytes=32 * 1024 * 1024,
        ),
    )(xt, w1, b1, w2, b2, w3t, b3)

    return out_t[:, :batch].T                            # [batch, 1]


def init_params(key):
    """Torch-native nn.Linear shapes: weight [out, in], bias [out]."""
    k1, k2, k3, k4, k5, k6 = jax.random.split(key, 6)

    def lin(kw, kb, fan_in, fan_out):
        bound = 1.0 / jnp.sqrt(jnp.float32(fan_in))
        w = jax.random.uniform(kw, (fan_out, fan_in), jnp.float32, -bound, bound)
        b = jax.random.uniform(kb, (fan_out,), jnp.float32, -bound, bound)
        return w, b

    w1, b1 = lin(k1, k2, 8, 64)
    w2, b2 = lin(k3, k4, 64, 64)
    w3, b3 = lin(k5, k6, 64, 1)
    return {"w1": w1, "b1": b1, "w2": w2, "b2": b2, "w3": w3, "b3": b3}


def reference_forward(x, p):
    h = jnp.maximum(x @ p["w1"].T + p["b1"], 0.0)
    h = jnp.maximum(h @ p["w2"].T + p["b2"], 0.0)
    return h @ p["w3"].T + p["b3"]


if __name__ == "__main__":
    key = jax.random.PRNGKey(0)
    kx, kx2, kx3, kp = jax.random.split(key, 4)
    params = init_params(kp)

    # bf16 matmul operands (f32 accumulation) -> slightly looser tolerance.
    ATOL, RTOL = 3e-2, 3e-2

    # Small batch: single 128-lane tile, 1-step grid.
    batch = 8
    x = jax.random.normal(kx, (batch, 8), jnp.float32)
    out = jax.block_until_ready(neural_net_forward(x, params))
    ref = reference_forward(x, params)
    assert out.shape == (batch, 1)
    assert jnp.allclose(out, ref, atol=ATOL, rtol=RTOL)

    # Non-multiple batch: pads 200 -> 256 lanes, 2-step parallel grid.
    batch2 = 200
    x2 = jax.random.normal(kx2, (batch2, 8), jnp.float32)
    out2 = jax.block_until_ready(neural_net_forward(x2, params))
    ref2 = reference_forward(x2, params)
    assert out2.shape == (batch2, 1)
    assert jnp.allclose(out2, ref2, atol=ATOL, rtol=RTOL)

    # Batch that exercises the partial (masked) last tile: 300 -> 384 lanes,
    # tb=256, grid=2 with the second tile only partially in-bounds.
    batch3 = 300
    x3 = jax.random.normal(kx3, (batch3, 8), jnp.float32)
    out3 = jax.block_until_ready(neural_net_forward(x3, params))
    ref3 = reference_forward(x3, params)
    assert out3.shape == (batch3, 1)
    assert jnp.allclose(out3, ref3, atol=ATOL, rtol=RTOL)

    print("KERNEL_OK")
</pallas_src>

<mosaic_0001>
module attributes {stable_mosaic.version = 11 : i64} {
  func.func @_mlp_kernel(%arg0: i32, %arg1: memref<8x128xf32, #tpu.memory_space<vmem>>, %arg2: memref<64x8xbf16, #tpu.memory_space<vmem>>, %arg3: memref<64x1xf32, #tpu.memory_space<vmem>>, %arg4: memref<64x64xbf16, #tpu.memory_space<vmem>>, %arg5: memref<64x1xf32, #tpu.memory_space<vmem>>, %arg6: memref<64x1xf32, #tpu.memory_space<vmem>>, %arg7: memref<1xf32, #tpu.memory_space<smem>>, %arg8: memref<1x128xf32, #tpu.memory_space<vmem>>) attributes {dimension_semantics = [#tpu.dimension_semantics<parallel>], iteration_bounds = array<i64: 1>, scalar_prefetch = 0 : i64, scratch_operands = 0 : i64, tpu.core_type = #tpu.core_type<tc>, window_params = [{transform_indices = @transform_0, window_bounds = array<i64: 8, 128>}, {pipeline_mode = #tpu.pipeline_mode<synchronous>, transform_indices = @transform_1, window_bounds = array<i64: 64, 8>}, {pipeline_mode = #tpu.pipeline_mode<synchronous>, transform_indices = @transform_2, window_bounds = array<i64: 64, 1>}, {pipeline_mode = #tpu.pipeline_mode<synchronous>, transform_indices = @transform_3, window_bounds = array<i64: 64, 64>}, {pipeline_mode = #tpu.pipeline_mode<synchronous>, transform_indices = @transform_4, window_bounds = array<i64: 64, 1>}, {pipeline_mode = #tpu.pipeline_mode<synchronous>, transform_indices = @transform_5, window_bounds = array<i64: 64, 1>}, {transform_indices = @transform_6, window_bounds = array<i64: 1>}, {transform_indices = @transform_7, window_bounds = array<i64: 1, 128>}]} {
    %c0 = arith.constant 0 : index
    %c0_0 = arith.constant 0 : index
    %0 = vector.load %arg1[%c0, %c0_0] : memref<8x128xf32, #tpu.memory_space<vmem>>, vector<8x128xf32>
    %1 = arith.truncf %0 : vector<8x128xf32> to vector<8x128xbf16>
    %c0_1 = arith.constant 0 : index
    %c0_2 = arith.constant 0 : index
    %2 = vector.load %arg2[%c0_1, %c0_2] : memref<64x8xbf16, #tpu.memory_space<vmem>>, vector<64x8xbf16>
    %cst = arith.constant dense<0.000000e+00> : vector<64x128xf32>
    %3 = tpu.matmul %2, %1, %cst {dimension_numbers = #tpu.dot_dimension_numbers<[1], [0], [0], [1], [0, 0, 1, 1], [], []>} : vector<64x8xbf16>, vector<8x128xbf16>, vector<64x128xf32> -> vector<64x128xf32>
    %c0_3 = arith.constant 0 : index
    %c0_4 = arith.constant 0 : index
    %4 = vector.load %arg3[%c0_3, %c0_4] : memref<64x1xf32, #tpu.memory_space<vmem>>, vector<64x1xf32>
    %5 = vector.broadcast %4 : vector<64x1xf32> to vector<64x128xf32>
    %6 = arith.addf %3, %5 : vector<64x128xf32>
    %cst_5 = arith.constant 0.000000e+00 : f32
    %7 = vector.broadcast %cst_5 : f32 to vector<64x128xf32>
    %8 = arith.maximumf %6, %7 : vector<64x128xf32>
    %c0_6 = arith.constant 0 : index
    %c0_7 = arith.constant 0 : index
    %9 = vector.load %arg4[%c0_6, %c0_7] : memref<64x64xbf16, #tpu.memory_space<vmem>>, vector<64x64xbf16>
    %10 = arith.truncf %8 : vector<64x128xf32> to vector<64x128xbf16>
    %cst_8 = arith.constant dense<0.000000e+00> : vector<64x128xf32>
    %11 = tpu.matmul %9, %10, %cst_8 {dimension_numbers = #tpu.dot_dimension_numbers<[1], [0], [0], [1], [0, 0, 1, 1], [], []>} : vector<64x64xbf16>, vector<64x128xbf16>, vector<64x128xf32> -> vector<64x128xf32>
    %c0_9 = arith.constant 0 : index
    %c0_10 = arith.constant 0 : index
    %12 = vector.load %arg5[%c0_9, %c0_10] : memref<64x1xf32, #tpu.memory_space<vmem>>, vector<64x1xf32>
    %13 = vector.broadcast %12 : vector<64x1xf32> to vector<64x128xf32>
    %14 = arith.addf %11, %13 : vector<64x128xf32>
    %cst_11 = arith.constant 0.000000e+00 : f32
    %15 = vector.broadcast %cst_11 : f32 to vector<64x128xf32>
    %16 = arith.maximumf %14, %15 : vector<64x128xf32>
    %c0_12 = arith.constant 0 : index
    %c0_13 = arith.constant 0 : index
    %17 = vector.load %arg6[%c0_12, %c0_13] : memref<64x1xf32, #tpu.memory_space<vmem>>, vector<64x1xf32>
    %18 = vector.broadcast %17 : vector<64x1xf32> to vector<64x128xf32>
    %19 = arith.mulf %18, %16 : vector<64x128xf32>
    %cst_14 = arith.constant dense<0.000000e+00> : vector<128xf32>
    %20 = vector.multi_reduction <add>, %19, %cst_14 [0] : vector<64x128xf32> to vector<128xf32>
    %21 = vector.shape_cast %20 : vector<128xf32> to vector<1x128xf32>
    %c0_15 = arith.constant 0 : index
    %22 = memref.load %arg7[%c0_15] : memref<1xf32, #tpu.memory_space<smem>>
    %23 = vector.broadcast %22 : f32 to vector<1x128xf32>
    %24 = arith.addf %21, %23 : vector<1x128xf32>
    %c0_16 = arith.constant 0 : index
    %c0_17 = arith.constant 0 : index
    %25 = vector.load %arg8[%c0_16, %c0_17] : memref<1x128xf32, #tpu.memory_space<vmem>>, vector<1x128xf32>
    tpu.vector_store %arg8[%c0_16, %c0_17], %24 {strides = array<i32>} : memref<1x128xf32, #tpu.memory_space<vmem>>, vector<1x128xf32>,
    return
  }
  func.func @transform_0(%arg0: i32) -> (i32, i32) {
    %c0_i32 = arith.constant 0 : i32
    %c0_i32_0 = arith.constant 0 : i32
    return %c0_i32, %arg0 : i32, i32
  }
  func.func @transform_1(%arg0: i32) -> (i32, i32) {
    %c0_i32 = arith.constant 0 : i32
    %c0_i32_0 = arith.constant 0 : i32
    %c0_i32_1 = arith.constant 0 : i32
    return %c0_i32, %c0_i32_0 : i32, i32
  }
  func.func @transform_2(%arg0: i32) -> (i32, i32) {
    %c0_i32 = arith.constant 0 : i32
    %c0_i32_0 = arith.constant 0 : i32
    %c0_i32_1 = arith.constant 0 : i32
    return %c0_i32, %c0_i32_0 : i32, i32
  }
  func.func @transform_3(%arg0: i32) -> (i32, i32) {
    %c0_i32 = arith.constant 0 : i32
    %c0_i32_0 = arith.constant 0 : i32
    %c0_i32_1 = arith.constant 0 : i32
    return %c0_i32, %c0_i32_0 : i32, i32
  }
  func.func @transform_4(%arg0: i32) -> (i32, i32) {
    %c0_i32 = arith.constant 0 : i32
    %c0_i32_0 = arith.constant 0 : i32
    %c0_i32_1 = arith.constant 0 : i32
    return %c0_i32, %c0_i32_0 : i32, i32
  }
  func.func @transform_5(%arg0: i32) -> (i32, i32) {
    %c0_i32 = arith.constant 0 : i32
    %c0_i32_0 = arith.constant 0 : i32
    %c0_i32_1 = arith.constant 0 : i32
    return %c0_i32, %c0_i32_0 : i32, i32
  }
  func.func @transform_6(%arg0: i32) -> i32 {
    %c0_i32 = arith.constant 0 : i32
    %c0_i32_0 = arith.constant 0 : i32
    return %c0_i32 : i32
  }
  func.func @transform_7(%arg0: i32) -> (i32, i32) {
    %c0_i32 = arith.constant 0 : i32
    %c0_i32_0 = arith.constant 0 : i32
    return %c0_i32, %arg0 : i32, i32
  }
}

</mosaic_0001>

<bundles_post_ra>
// kernel: tpu_custom_call.1
= control target key start
LH: loop header
LB: loop body
LE: loop exit
PB: predicated region body
PF: predicated region fallthrough
CT: control target
= control target key end

     0   :  { %vm120_vm0 = vcmask 1043456   ;;  %vm107_vm1 = vcmask 64512   ;;  %v548_v6 = vmov 0   ;;  %s703_s0 = inlined_call_operand.vmem [shape: f32[8,128], index: 0, kind: input, shape index: {}]   ;;  %s704_s1 = inlined_call_operand.vmem [shape: bf16[64,8], index: 1, kind: input, shape index: {}]   ;;  %s705_s2 = inlined_call_operand.vmem [shape: f32[64,1], index: 2, kind: input, shape index: {}]   ;;  %s706_s3 = inlined_call_operand.vmem [shape: bf16[64,64], index: 3, kind: input, shape index: {}]   ;;  %s707_s4 = inlined_call_operand.vmem [shape: f32[64,1], index: 4, kind: input, shape index: {}]   ;;  %s708_s5 = inlined_call_operand.vmem [shape: f32[64,1], index: 5, kind: input, shape index: {}]   ;;  %s709_s6 = inlined_call_operand.<no memory space> [shape: f32[1], index: 6, kind: input, shape index: {}]   ;;  %s710_s7 = inlined_call_operand.hbm [shape: f32[1,128], index: 7, kind: output, shape index: {}]  }
   0x1   :  { %v29_v0 = vld [vmem:[%s703_s0] sm:$0xff]  ;;  %v519_v4 = vld [vmem:[%s704_s1 + $0x8] sm:$0xff]   ;;  %v520_v5 = vld [vmem:[%s704_s1 + $0x10] sm:$0xff]   ;;  %516 = vset.pattern.permute.xlu0 %v548_v6  ;;  %517 = vset.pattern.permute.xlu1 %v548_v6 }
   0x2   :  { %v30_v1 = vpack.c.bf16 %v29_v0, %v29_v0  ;;  %v518_v2 = vld [vmem:[%s704_s1] sm:$0xff]   ;;  %v45_v7 = vld [vmem:[%s705_s2 + $0x30] sm:$0xff]  ;;  %v46_v9 = vld [vmem:[%s705_s2 + $0x38] sm:$0xff] }
   0x3   :  { %481 = vmatprep.mubr.msk.bf16.mxu0 %vm107_vm1, %v518_v2  ;;  %79 = vperm.xlu0 %516, %v45_v7   ;;  %v43_v8 = vld [vmem:[%s705_s2 + $0x20] sm:$0xff]  ;;  %v44_v10 = vld [vmem:[%s705_s2 + $0x28] sm:$0xff]  ;;  %v41_v11 = vld [vmem:[%s705_s2 + $0x10] sm:$0xff] }
   0x4   :  { %513 = vmatprep.subr.msk.bf16.mxu0 %vm120_vm0, %v30_v1  ;;  %v122_v3 = vsel %vm120_vm0, %v30_v1, 0  ;;  %69 = vperm.xlu1 %517, %v43_v8   ;;  %v521_v12 = vld [vmem:[%s704_s1 + $0x18] sm:$0xff]   ;;  %v39_v14 = vld [vmem:[%s705_s2] sm:$0xff]  ;;  %v40_v15 = vld [vmem:[%s705_s2 + $0x8] sm:$0xff] }
   0x5   :  { %480 = vmatpush3.bf16.msra.mxu0 %v122_v3  ;;  %v42_v13 = vld [vmem:[%s705_s2 + $0x18] sm:$0xff] }
   0x7   :  { %84 = vperm.xlu0 %516, %v46_v9  }
   0x8   :  { %482 = vmatmul.mubr.msk.bf16.vlgmr.msra.gmra.mxu0 %vm107_vm1, %v519_v4  ;;  %74 = vperm.xlu1 %517, %v44_v10  }
   0x9   :  { %485 = vmatprep.mubr.msk.bf16.mxu0 %vm107_vm1, %v520_v5 }
   0xb   :  { %59 = vperm.xlu0 %516, %v41_v11  }
   0xc   :  { %64 = vperm.xlu1 %517, %v42_v13  }
  0x10   :  { %486 = vmatmul.mubr.msk.bf16.gmra.mxu0 %vm107_vm1, %v521_v12 }
  0x11   :  { %13 = vsyncpa [#allocation4], 0  ;;  %49 = vperm.xlu0 %516, %v39_v14   ;;  %54 = vperm.xlu1 %517, %v40_v15   ;;  %v209_v16 = vld [vmem:[%s707_s4] sm:$0xff]  ;;  %v210_v17 = vld [vmem:[%s707_s4 + $0x8] sm:$0xff]  ;;  %vm277_vm2 = vcmask 523264   ;;  %s549_s13 = smov [#allocation3]  }
  0x12   :  { %v211_v18 = vld [vmem:[%s707_s4 + $0x10] sm:$0xff]  ;;  %v212_v19 = vld [vmem:[%s707_s4 + $0x18] sm:$0xff]  ;;  %v363_v20 = vld [vmem:[%s708_s5] sm:$0xff]  ;;  %s442_s14 = sshll.u32 %s549_s13, 4  ;;  %s443_s14 = int_to_ptr.vmem [resolvable:$true] %s442_s14 }
  0x13   :  { %v364_v21 = vld [vmem:[%s708_s5 + $0x8] sm:$0xff]  ;;  %v213_v22 = vld [vmem:[%s707_s4 + $0x20] sm:$0xff]  ;;  %v365_v23 = vld [vmem:[%s708_s5 + $0x10] sm:$0xff]  ;;  %s526_s15 = scalar_lea.vmem %s443_s14, 16  ;;  %s530_s16 = scalar_lea.vmem %s443_s14, 32 }
  0x14   :  { %v214_v24 = vld [vmem:[%s707_s4 + $0x28] sm:$0xff]  ;;  %v366_v25 = vld [vmem:[%s708_s5 + $0x18] sm:$0xff]  ;;  %v215_v26 = vld [vmem:[%s707_s4 + $0x30] sm:$0xff]  ;;  %p527_p0 = scmp.ne.s32.totalorder %s443_s14, %s526_s15  ;;  %p531_p1 = scmp.lt.s32.totalorder %s443_s14, %s443_s14 }
  0x15   :  { %219 = vperm.xlu0 %516, %v209_v16   ;;  %224 = vperm.xlu1 %517, %v210_v17   ;;  %v367_v27 = vld [vmem:[%s708_s5 + $0x20] sm:$0xff]  ;;  %v216_v28 = vld [vmem:[%s707_s4 + $0x38] sm:$0xff]  ;;  %v368_v29 = vld [vmem:[%s708_s5 + $0x28] sm:$0xff]  ;;  %p532_p2 = scmp.lt.s32.totalorder %s530_s16, %s526_s15 }
  0x16   :  { %v369_v30 = vld [vmem:[%s708_s5 + $0x30] sm:$0xff]  ;;  %v370_v31 = vld [vmem:[%s708_s5 + $0x38] sm:$0xff]  ;;  %v522_v32 = vld [vmem:[%s706_s3] sm:$0xff]  }
  0x17   :  { %v523_v33 = vld [vmem:[%s706_s3 + $0x10] sm:$0xff]   ;;  %497 = vmatprep.mubr.msk.bf16.mxu0 %vm277_vm2, %v522_v32  ;;  %v524_v6 = vld [vmem:[%s706_s3 + $0x8] sm:$0xff]   ;;  %v525_v7 = vld [vmem:[%s706_s3 + $0x18] sm:$0xff]   ;;  %p533_p3 = por %p532_p2, %p531_p1 }
  0x18   :  { %501 = vmatprep.mubr.msk.bf16.mxu1 %vm277_vm2, %v523_v33 }
  0x19   :  { %229 = vperm.xlu0 %516, %v211_v18   ;;  %234 = vperm.xlu1 %517, %v212_v19   ;;  %p534_p4 = pnand %p533_p3, %p527_p0 }
  0x1d   :  { %373 = vperm.xlu0 %516, %v363_v20   ;;  %378 = vperm.xlu1 %517, %v364_v21  }
  0x21   :  { %239 = vperm.xlu0 %516, %v213_v22   ;;  %383 = vperm.xlu1 %517, %v365_v23  }
  0x25   :  { %244 = vperm.xlu0 %516, %v214_v24   ;;  %388 = vperm.xlu1 %517, %v366_v25  }
  0x29   :  { %249 = vperm.xlu0 %516, %v215_v26   ;;  %393 = vperm.xlu1 %517, %v367_v27  }
  0x2d   :  { %254 = vperm.xlu0 %516, %v216_v28   ;;  %398 = vperm.xlu1 %517, %v368_v29  }
  0x31   :  { %403 = vperm.xlu0 %516, %v369_v30   ;;  %408 = vperm.xlu1 %517, %v370_v31  }
  0x7e   :  { %v80_v36 = vpop.permute.xlu0 %79 }
  0x7f   :  { %v70_v34 = vpop.permute.xlu1 %69 }
  0x82   :  { %v85_v41 = vpop.permute.xlu0 %84 }
  0x83   :  { %v75_v39 = vpop.permute.xlu1 %74 }
  0x86   :  { %v60_v49 = vpop.permute.xlu0 %59 }
  0x87   :  { %v65_v45 = vpop.permute.xlu1 %64 }
  0x8c   :  { %v55_v59 = vpop.permute.xlu1 %54  ;;  %v50_v63 = vpop.permute.xlu0 %49 }
  0x90   :  { %v220_v8 = vpop.permute.xlu0 %219  ;;  %v225_v9 = vpop.permute.xlu1 %224 }
  0x94   :  { %v230_v10 = vpop.permute.xlu0 %229  ;;  %v235_v11 = vpop.permute.xlu1 %234 }
  0x98   :  { %v374_v12 = vpop.permute.xlu0 %373  ;;  %v379_v13 = vpop.permute.xlu1 %378 }
  0x9c   :  { %v240_v14 = vpop.permute.xlu0 %239  ;;  %v384_v15 = vpop.permute.xlu1 %383 }
  0xa0   :  { %v245_v18 = vpop.permute.xlu0 %244  ;;  %v389_v21 = vpop.permute.xlu1 %388 }
  0xa4   :  { %v250_v30 = vpop.permute.xlu0 %249 }
  0xc8   :  { %v483_v35 = vpop.f32.mrf.mxu0 }
  0xc9   :  { %v167_v55 = vadd.f32 %v483_v35, %v60_v49  ;;  %v394_v35 = vpop.permute.xlu1 %393 }
  0xca   :  { %v158_v37 = vpop.f32.mrf.mxu0 }
  0xcb   :  { %v191_v0 = vmax.f32 %v167_v55, 0.0  ;;  %v159_v1 = vadd.f32 %v158_v37, %v50_v63 }
  0xcc   :  { %v484_v38 = vpop.f32.mrf.mxu0 }
  0xcd   :  { %v170_v51 = vadd.f32 %v484_v38, %v65_v45  ;;  %v189_v4 = vmax.f32 %v159_v1, 0.0  ;;  %v399_v49 = vpop.permute.xlu1 %398 }
  0xce   :  { %v161_v40 = vpop.f32.mrf.mxu0 }
  0xcf   :  { %v192_v60 = vmax.f32 %v170_v51, 0.0  ;;  %v162_v61 = vadd.f32 %v161_v40, %v55_v59 }
  0xd0   :  { %v487_v42 = vpop.f32.mrf.mxu0 }
  0xd1   :  { %v183_v44 = vadd.f32 %v487_v42, %v80_v36  ;;  %v206_v2 = vpack.c.bf16 %v192_v60, %v191_v0  ;;  %v190_v3 = vmax.f32 %v162_v61, 0.0  ;;  %v409_v59 = vpop.permute.xlu1 %408 }
  0xd2   :  { %v174_v43 = vpop.f32.mrf.mxu0 }
  0xd3   :  { %v175_v47 = vadd.f32 %v174_v43, %v70_v34  ;;  %v195_v52 = vmax.f32 %v183_v44, 0.0  ;;  %v205_v5 = vpack.c.bf16 %v190_v3, %v189_v4  ;;  %v255_v44 = vpop.permute.xlu0 %254  ;;  %v433_v4 = vstv %s709_s6 }
  0xd4   :  { %v488_v46 = vpop.f32.mrf.mxu0 }
  0xd5   :  { %v186_v48 = vadd.f32 %v488_v46, %v85_v41  ;;  %v193_v56 = vmax.f32 %v175_v47, 0.0 }
  0xd6   :  { %v177_v50 = vpop.f32.mrf.mxu0 }
  0xd7   :  { %v196_v53 = vmax.f32 %v186_v48, 0.0  ;;  %v178_v54 = vadd.f32 %v177_v50, %v75_v39 }
  0xd9   :  { %v208_v57 = vpack.c.bf16 %v196_v53, %v195_v52  ;;  %v194_v58 = vmax.f32 %v178_v54, 0.0 }
  0xdb   :  { %v207_v62 = vpack.c.bf16 %v194_v58, %v193_v56  ;;  %489 = vmatprep.subr.bf16.mxu0 %v208_v57  ;;  %505 = vmatprep.subr.bf16.mxu1 %v208_v57  ;;  %v404_v56 = vpop.permute.xlu0 %403 }
  0xdc   :  { %490 = vmatpush3.bf16.msra.mxu0 %v208_v57  ;;  %509 = vmatpush3.bf16.msra.mxu1 %v208_v57 }
  0xdd   :  { %491 = vmatprep.subr.bf16.mxu0 %v207_v62  ;;  %506 = vmatprep.subr.bf16.mxu1 %v207_v62 }
  0xe0   :  { %492 = vmatpush3.bf16.msra.mxu0 %v207_v62  ;;  %510 = vmatpush3.bf16.msra.mxu1 %v207_v62 }
  0xe1   :  { %493 = vmatprep.subr.bf16.mxu0 %v206_v2  ;;  %507 = vmatprep.subr.bf16.mxu1 %v206_v2 }
  0xe4   :  { %494 = vmatpush3.bf16.msra.mxu0 %v206_v2  ;;  %511 = vmatpush3.bf16.msra.mxu1 %v206_v2 }
  0xe5   :  { %495 = vmatprep.subr.bf16.mxu0 %v205_v5  ;;  %508 = vmatprep.subr.bf16.mxu1 %v205_v5 }
  0xe8   :  { %496 = vmatpush3.bf16.msra.mxu0 %v205_v5  ;;  %512 = vmatpush3.bf16.msra.mxu1 %v205_v5 }
  0xeb   :  { %498 = vmatmul.mubr.msk.bf16.vlgmr.msra.gmra.mxu0 %vm277_vm2, %v524_v6  ;;  %502 = vmatmul.mubr.msk.bf16.vlgmr.msra.gmra.mxu1 %vm277_vm2, %v525_v7 }
 0x1ab   :  { %v499_v16 = vpop.f32.mrf.mxu0  ;;  %v503_v17 = vpop.f32.mrf.mxu1 }
 0x1ac   :  { %v333_v25 = vadd.f32 %v499_v16, %v230_v10  ;;  %v349_v41 = vadd.f32 %v503_v17, %v250_v30 }
 0x1ad   :  { %v324_v19 = vpop.f32.mrf.mxu0  ;;  %v340_v20 = vpop.f32.mrf.mxu1 }
 0x1ae   :  { %v325_v22 = vadd.f32 %v324_v19, %v220_v8  ;;  %v357_v32 = vmax.f32 %v333_v25, 0.0  ;;  %v341_v33 = vadd.f32 %v340_v20, %v240_v14  ;;  %v361_v50 = vmax.f32 %v349_v41, 0.0 }
 0x1af   :  { %v500_v23 = vpop.f32.mrf.mxu0  ;;  %v504_v24 = vpop.f32.mrf.mxu1 }
 0x1b0   :  { %v355_v27 = vmax.f32 %v325_v22, 0.0  ;;  %v336_v28 = vadd.f32 %v500_v23, %v235_v11  ;;  %v413_v40 = vmul.f32 %v384_v15, %v357_v32  ;;  %v359_v42 = vmax.f32 %v341_v33, 0.0 }
 0x1b1   :  { %v327_v26 = vpop.f32.mrf.mxu0  ;;  %v343_v31 = vpop.f32.mrf.mxu1  ;;  %v352_v46 = vadd.f32 %v504_v24, %v255_v44  ;;  %v417_v57 = vmul.f32 %v404_v56, %v361_v50 }
 0x1b2   :  { %v328_v29 = vadd.f32 %v327_v26, %v225_v9  ;;  %v411_v36 = vmul.f32 %v374_v12, %v355_v27  ;;  %v358_v37 = vmax.f32 %v336_v28, 0.0  ;;  %v344_v39 = vadd.f32 %v343_v31, %v245_v18 }
 0x1b3   :  { %v415_v51 = vmul.f32 %v394_v35, %v359_v42  ;;  %v362_v53 = vmax.f32 %v352_v46, 0.0 }
 0x1b4   :  { %v356_v34 = vmax.f32 %v328_v29, 0.0  ;;  %v414_v45 = vmul.f32 %v389_v21, %v358_v37  ;;  %v360_v48 = vmax.f32 %v344_v39, 0.0 }
 0x1b5   :  { %v418_v60 = vmul.f32 %v409_v59, %v362_v53 }
 0x1b6   :  { %v412_v38 = vmul.f32 %v379_v13, %v356_v34  ;;  %v416_v54 = vmul.f32 %v399_v49, %v360_v48 }
 0x1b8   :  { %v419_v43 = vadd.f32 %v412_v38, %v411_v36 }
 0x1ba   :  { %v420_v47 = vadd.f32 %v419_v43, %v413_v40 }
 0x1bc   :  { %v421_v52 = vadd.f32 %v420_v47, %v414_v45 }
 0x1be   :  { %v422_v55 = vadd.f32 %v421_v52, %v415_v51 }
 0x1c0   :  { %v423_v58 = vadd.f32 %v422_v55, %v416_v54 }
 0x1c2   :  { %v424_v61 = vadd.f32 %v423_v58, %v417_v57 }
 0x1c4   :  { %v425_v62 = vadd.f32 %v424_v61, %v418_v60 }
 0x1c6   :  { %v426_v63 = vrot.slane %v425_v62, 4 }
 0x1c8   :  { %v427_v0 = vadd.f32 %v426_v63, %v425_v62 }
 0x1ca   :  { %v428_v1 = vrot.slane %v427_v0, 2 }
 0x1cc   :  { %v429_v2 = vadd.f32 %v428_v1, %v427_v0 }
 0x1ce   :  { %v430_v3 = vrot.slane %v429_v2, 1 }
 0x1d0   :  { %v431_v5 = vadd.f32 %v430_v3, %v429_v2 }
 0x1d2   :  { %v434_v6 = vadd.f32 %v433_v4, %v431_v5 }
 0x1d4   :  { %435 = vst [vmem:[#allocation3] sm:$0x1] %v434_v6 }
 0x1d5   :  { %537 = shalt.err (!%p534_p4)
}
 0x1d6   :  { %445 = dma.vmem_to_hbm [thread:$0]  %s443_s14, 16, %s710_s7, [#allocation4]  }
 0x1d7   :  { %546 = dma.done.wait [#allocation4], 16  }
 0x1d8   :  { %547 = vsyncadd [#allocation4], 4294967280 }
 0x1d9   :  { %449 = vsyncpa [#allocation4], 1 }

</bundles_post_ra>
